<compile_context>
chip_gen: v5e
topology: v5e:2x2
jax: 0.10.0
libtpu: 0.0.40
codegen_flags: <defaults>
</compile_context>

<pallas_src>
import functools

import jax
import jax.numpy as jnp
from jax.experimental import pallas as pl
from jax.experimental.pallas import tpu as pltpu

LANE = 128
SUBLANE = 8
ACC_ROWS = 32          # widened accumulator height (multiple of SUBLANE)


def _round_up(x, m):
    return ((x + m - 1) // m) * m


def _cdiv(a, b):
    return (a + b - 1) // b


def _default_num_cores():
    # 2 TensorCores per chip only on v7x; single TC on v5e / v6e (and most others).
    try:
        kind = jax.devices()[0].device_kind.lower()
        if "v7" in kind:
            return 2
    except Exception:
        pass
    return 1


def _focal_loss_kernel(x_ref, y_ref, loss_out_ref, y_out_ref,
                       *, gamma, eps, block_rows, chunks_per_core, rows_valid):
    c = pl.program_id(0)          # core / parallel axis
    i = pl.program_id(1)          # chunk / reduction axis

    # Output blocks are VMEM-resident along i (constant block index) -> accumulate
    # straight into them; zero at the start of each core's reduction.
    @pl.when(i == 0)
    def _():
        loss_out_ref[...] = jnp.zeros_like(loss_out_ref)
        y_out_ref[...] = jnp.zeros_like(y_out_ref)

    def accumulate(x, y):
        # sigmoid via a single tanh: at most 2 EUP pushes per x-vreg (tanh + log).
        p = 0.5 * jnp.tanh(0.5 * x) + 0.5
        p = jnp.clip(p, eps, 1.0 - eps)           # torch .clamp parity (before log)
        one_minus_p = 1.0 - p
        loss = (-y) * jnp.log(p)
        g = float(gamma)
        if g == int(g) and 0 <= int(g) <= 8:
            # integer gamma (module default 2): explicit multiply chain, no pow/EUP
            for _ in range(int(g)):
                loss = loss * one_minus_p
        else:
            loss = loss * one_minus_p ** g
        # (block_rows,128) -> (block_rows//32, 32, 128) is a tile-preserving reshape;
        # the axis-0 sum is 4 independent vreg add chains (better ILP than 8x128).
        loss_out_ref[...] += jnp.sum(loss.reshape(-1, ACC_ROWS, LANE), axis=0)
        y_out_ref[...] += jnp.sum(y.reshape(-1, ACC_ROWS, LANE), axis=0)

    x = x_ref[...].astype(jnp.float32)
    y = y_ref[...].astype(jnp.float32)

    chunk = c * chunks_per_core + i                    # unclamped global chunk id
    local_limit = rows_valid - chunk * block_rows      # # of valid rows in this block
    needs_mask = local_limit < block_rows

    @pl.when(jnp.logical_not(needs_mask))
    def _():
        # Fast path: every row of the block is valid -> no iota / compare / select.
        accumulate(x, y)

    @pl.when(needs_mask)
    def _():
        # Ragged last block or clamped duplicate chunk: mask x as well as y so garbage
        # in the out-of-bounds VMEM region cannot produce NaN (0 * NaN = NaN).
        row_ids = jax.lax.broadcasted_iota(jnp.int32, x.shape, 0)
        valid = row_ids < local_limit
        accumulate(jnp.where(valid, x, 0.0), jnp.where(valid, y, 0.0))


def focal_loss_1(inputs, target, gamma=2.0, eps=1e-7, block_rows=4096, num_cores=None):
    """Pallas focal loss; returns a scalar float32 (== FocalLoss_1().forward)."""
    assert inputs.shape == target.shape

    if num_cores is None:
        num_cores = _default_num_cores()
    num_cores = max(1, int(num_cores))

    # Keep the original dtypes in HBM (bf16 stays bf16); cast to f32 in VMEM.
    x = inputs.reshape(-1)
    y = target.reshape(-1)
    n = x.shape[0]

    # Lane-pad only when n is not a multiple of 128 (padding has x == 0, y == 0 so it
    # contributes 0).  Typical NN shapes skip this, making the reshape a free bitcast.
    rem = n % LANE
    if rem:
        pad = LANE - rem
        x = jnp.pad(x, (0, pad))
        y = jnp.pad(y, (0, pad))
    rows = x.shape[0] // LANE
    x2 = x.reshape(rows, LANE)
    y2 = y.reshape(rows, LANE)

    # Tile sizing: large lane-dense slabs (4096x128 f32 = 2 MiB / input / buffer),
    # clamped down for small inputs; must stay a multiple of ACC_ROWS.
    block_rows = max(ACC_ROWS, _round_up(int(block_rows), ACC_ROWS))
    block_rows = min(block_rows, _round_up(rows, ACC_ROWS))
    total_chunks = _cdiv(rows, block_rows)
    chunks_per_core = _cdiv(total_chunks, num_cores)

    def in_index_map(c, i):
        # Trailing chunks past total_chunks are clamped back in bounds; the kernel's
        # row mask zeroes their contribution (at most num_cores-1 such blocks).
        return (jnp.minimum(c * chunks_per_core + i, total_chunks - 1), 0)

    kernel = functools.partial(
        _focal_loss_kernel,
        gamma=float(gamma),
        eps=float(eps),
        block_rows=block_rows,
        chunks_per_core=chunks_per_core,
        rows_valid=rows,
    )

    # Only core_parallel semantics actually shard a grid axis across TensorCores.
    if num_cores > 1:
        core_sem = getattr(pltpu, "CORE_PARALLEL", "parallel")
    else:
        core_sem = "arbitrary"

    loss_part, y_part = pl.pallas_call(
        kernel,
        out_shape=(
            jax.ShapeDtypeStruct((num_cores * ACC_ROWS, LANE), jnp.float32),
            jax.ShapeDtypeStruct((num_cores * ACC_ROWS, LANE), jnp.float32),
        ),
        grid_spec=pltpu.PrefetchScalarGridSpec(
            num_scalar_prefetch=0,
            grid=(num_cores, chunks_per_core),
            in_specs=[
                pl.BlockSpec((block_rows, LANE), in_index_map),
                pl.BlockSpec((block_rows, LANE), in_index_map),
            ],
            out_specs=[
                pl.BlockSpec((ACC_ROWS, LANE), lambda c, i: (c, 0)),
                pl.BlockSpec((ACC_ROWS, LANE), lambda c, i: (c, 0)),
            ],
        ),
        compiler_params=pltpu.CompilerParams(
            dimension_semantics=(core_sem, "arbitrary"),
            # 2 inputs x 2 buffers x 2 MiB = 8 MiB plus elementwise temporaries;
            # 48 MiB is comfortably within physical VMEM on v5e/v6e (128) and v7x (64).
            vmem_limit_bytes=48 * 1024 * 1024,
        ),
    )(x2, y2)

    # Tiny final cross-lane reduction + divide on (num_cores*32, 128) partials.
    return jnp.sum(loss_part) / jnp.sum(y_part)


def _reference(inputs, target, gamma=2.0, eps=1e-7):
    logit = jax.nn.sigmoid(inputs.astype(jnp.float32))
    logit = jnp.clip(logit, eps, 1.0 - eps)
    y = target.astype(jnp.float32)
    loss = -y * jnp.log(logit) * (1.0 - logit) ** gamma
    return loss.sum() / y.sum()


if __name__ == "__main__":
    key = jax.random.PRNGKey(0)
    k1, k2 = jax.random.split(key)

    # NCHW-like logits and binary multi-label targets
    x = jax.random.normal(k1, (2, 4, 16, 16), dtype=jnp.float32)
    y = (jax.random.uniform(k2, (2, 4, 16, 16)) > 0.5).astype(jnp.float32)

    out = focal_loss_1(x, y)
    out = jax.block_until_ready(out)

    ref = _reference(x, y)
    assert jnp.allclose(out, ref, rtol=2e-5, atol=1e-6), (out, ref)

    print("KERNEL_OK")
</pallas_src>

<mosaic_0001>
module attributes {stable_mosaic.version = 11 : i64} {
  func.func @_focal_loss_kernel(%arg0: i32, %arg1: i32, %arg2: memref<32x128xf32, #tpu.memory_space<vmem>>, %arg3: memref<32x128xf32, #tpu.memory_space<vmem>>, %arg4: memref<32x128xf32, #tpu.memory_space<vmem>>, %arg5: memref<32x128xf32, #tpu.memory_space<vmem>>) attributes {dimension_semantics = [#tpu.dimension_semantics<arbitrary>, #tpu.dimension_semantics<arbitrary>], iteration_bounds = array<i64: 1, 1>, scalar_prefetch = 0 : i64, scratch_operands = 0 : i64, tpu.core_type = #tpu.core_type<tc>, window_params = [{transform_indices = @transform_0, window_bounds = array<i64: 32, 128>}, {transform_indices = @transform_1, window_bounds = array<i64: 32, 128>}, {transform_indices = @transform_2, window_bounds = array<i64: 32, 128>}, {transform_indices = @transform_3, window_bounds = array<i64: 32, 128>}]} {
    %c0_i32 = arith.constant 0 : i32
    %0 = arith.cmpi eq, %arg1, %c0_i32 : i32
    %1 = arith.extui %0 : i1 to i32
    %c0_i32_0 = arith.constant 0 : i32
    %2 = arith.cmpi ne, %1, %c0_i32_0 : i32
    scf.if %2 {
      %cst = arith.constant 0.000000e+00 : f32
      %15 = vector.broadcast %cst : f32 to vector<32x128xf32>
      %c0_7 = arith.constant 0 : index
      %c0_8 = arith.constant 0 : index
      %16 = vector.load %arg4[%c0_7, %c0_8] : memref<32x128xf32, #tpu.memory_space<vmem>>, vector<32x128xf32>
      tpu.vector_store %arg4[%c0_7, %c0_8], %15 {strides = array<i32>} : memref<32x128xf32, #tpu.memory_space<vmem>>, vector<32x128xf32>,
      %cst_9 = arith.constant 0.000000e+00 : f32
      %17 = vector.broadcast %cst_9 : f32 to vector<32x128xf32>
      %c0_10 = arith.constant 0 : index
      %c0_11 = arith.constant 0 : index
      %18 = vector.load %arg5[%c0_10, %c0_11] : memref<32x128xf32, #tpu.memory_space<vmem>>, vector<32x128xf32>
      tpu.vector_store %arg5[%c0_10, %c0_11], %17 {strides = array<i32>} : memref<32x128xf32, #tpu.memory_space<vmem>>, vector<32x128xf32>,
    } else {
    }
    %c0 = arith.constant 0 : index
    %c0_1 = arith.constant 0 : index
    %3 = vector.load %arg2[%c0, %c0_1] : memref<32x128xf32, #tpu.memory_space<vmem>>, vector<32x128xf32>
    %c0_2 = arith.constant 0 : index
    %c0_3 = arith.constant 0 : index
    %4 = vector.load %arg3[%c0_2, %c0_3] : memref<32x128xf32, #tpu.memory_space<vmem>>, vector<32x128xf32>
    %c1_i32 = arith.constant 1 : i32
    %5 = arith.muli %arg0, %c1_i32 : i32
    %6 = arith.addi %5, %arg1 : i32
    %c32_i32 = arith.constant 32 : i32
    %7 = arith.muli %6, %c32_i32 : i32
    %c16_i32 = arith.constant 16 : i32
    %8 = arith.subi %c16_i32, %7 : i32
    %c32_i32_4 = arith.constant 32 : i32
    %9 = arith.cmpi slt, %8, %c32_i32_4 : i32
    %true = arith.constant true
    %10 = arith.xori %9, %true : i1
    %11 = arith.extui %10 : i1 to i32
    %c0_i32_5 = arith.constant 0 : i32
    %12 = arith.cmpi ne, %11, %c0_i32_5 : i32
    scf.if %12 {
      %cst = arith.constant 5.000000e-01 : f32
      %15 = vector.broadcast %cst : f32 to vector<32x128xf32>
      %16 = arith.mulf %15, %3 : vector<32x128xf32>
      %17 = math.tanh %16 : vector<32x128xf32>
      %cst_7 = arith.constant 5.000000e-01 : f32
      %18 = vector.broadcast %cst_7 : f32 to vector<32x128xf32>
      %19 = arith.mulf %18, %17 : vector<32x128xf32>
      %cst_8 = arith.constant 5.000000e-01 : f32
      %20 = vector.broadcast %cst_8 : f32 to vector<32x128xf32>
      %21 = arith.addf %19, %20 : vector<32x128xf32>
      %cst_9 = arith.constant 1.000000e-07 : f32
      %cst_10 = arith.constant 0.99999988 : f32
      %22 = vector.broadcast %cst_9 : f32 to vector<32x128xf32>
      %23 = arith.maximumf %22, %21 : vector<32x128xf32>
      %24 = vector.broadcast %cst_10 : f32 to vector<32x128xf32>
      %25 = arith.minimumf %24, %23 : vector<32x128xf32>
      %cst_11 = arith.constant 1.000000e+00 : f32
      %26 = vector.broadcast %cst_11 : f32 to vector<32x128xf32>
      %27 = arith.subf %26, %25 : vector<32x128xf32>
      %cst_12 = arith.constant 0.000000e+00 : f32
      %28 = vector.broadcast %cst_12 : f32 to vector<32x128xf32>
      %29 = arith.subf %28, %4 : vector<32x128xf32>
      %30 = math.log %25 : vector<32x128xf32>
      %31 = arith.mulf %29, %30 : vector<32x128xf32>
      %32 = arith.mulf %31, %27 : vector<32x128xf32>
      %33 = arith.mulf %32, %27 : vector<32x128xf32>
      %c0_13 = arith.constant 0 : index
      %c0_14 = arith.constant 0 : index
      %34 = vector.load %arg4[%c0_13, %c0_14] : memref<32x128xf32, #tpu.memory_space<vmem>>, vector<32x128xf32>
      %35 = vector.shape_cast %33 : vector<32x128xf32> to vector<1x32x128xf32>
      %cst_15 = arith.constant dense<0.000000e+00> : vector<32x128xf32>
      %36 = vector.multi_reduction <add>, %35, %cst_15 [0] : vector<1x32x128xf32> to vector<32x128xf32>
      %37 = arith.addf %34, %36 : vector<32x128xf32>
      %c0_16 = arith.constant 0 : index
      %c0_17 = arith.constant 0 : index
      %38 = vector.load %arg4[%c0_16, %c0_17] : memref<32x128xf32, #tpu.memory_space<vmem>>, vector<32x128xf32>
      tpu.vector_store %arg4[%c0_16, %c0_17], %37 {strides = array<i32>} : memref<32x128xf32, #tpu.memory_space<vmem>>, vector<32x128xf32>,
      %c0_18 = arith.constant 0 : index
      %c0_19 = arith.constant 0 : index
      %39 = vector.load %arg5[%c0_18, %c0_19] : memref<32x128xf32, #tpu.memory_space<vmem>>, vector<32x128xf32>
      %40 = vector.shape_cast %4 : vector<32x128xf32> to vector<1x32x128xf32>
      %cst_20 = arith.constant dense<0.000000e+00> : vector<32x128xf32>
      %41 = vector.multi_reduction <add>, %40, %cst_20 [0] : vector<1x32x128xf32> to vector<32x128xf32>
      %42 = arith.addf %39, %41 : vector<32x128xf32>
      %c0_21 = arith.constant 0 : index
      %c0_22 = arith.constant 0 : index
      %43 = vector.load %arg5[%c0_21, %c0_22] : memref<32x128xf32, #tpu.memory_space<vmem>>, vector<32x128xf32>
      tpu.vector_store %arg5[%c0_21, %c0_22], %42 {strides = array<i32>} : memref<32x128xf32, #tpu.memory_space<vmem>>, vector<32x128xf32>,
    } else {
    }
    %13 = arith.extui %9 : i1 to i32
    %c0_i32_6 = arith.constant 0 : i32
    %14 = arith.cmpi ne, %13, %c0_i32_6 : i32
    scf.if %14 {
      %15 = tpu.iota {dimensions = array<i32: 0>} : vector<32x128xi32>
      %16 = vector.broadcast %8 : i32 to vector<32x128xi32>
      %17 = arith.cmpi slt, %15, %16 : vector<32x128xi32>
      %cst = arith.constant 0.000000e+00 : f32
      %18 = vector.broadcast %cst : f32 to vector<32x128xf32>
      %19 = arith.select %17, %3, %18 : vector<32x128xi1>, vector<32x128xf32>
      %cst_7 = arith.constant 0.000000e+00 : f32
      %20 = vector.broadcast %cst_7 : f32 to vector<32x128xf32>
      %21 = arith.select %17, %4, %20 : vector<32x128xi1>, vector<32x128xf32>
      %cst_8 = arith.constant 5.000000e-01 : f32
      %22 = vector.broadcast %cst_8 : f32 to vector<32x128xf32>
      %23 = arith.mulf %22, %19 : vector<32x128xf32>
      %24 = math.tanh %23 : vector<32x128xf32>
      %cst_9 = arith.constant 5.000000e-01 : f32
      %25 = vector.broadcast %cst_9 : f32 to vector<32x128xf32>
      %26 = arith.mulf %25, %24 : vector<32x128xf32>
      %cst_10 = arith.constant 5.000000e-01 : f32
      %27 = vector.broadcast %cst_10 : f32 to vector<32x128xf32>
      %28 = arith.addf %26, %27 : vector<32x128xf32>
      %cst_11 = arith.constant 1.000000e-07 : f32
      %cst_12 = arith.constant 0.99999988 : f32
      %29 = vector.broadcast %cst_11 : f32 to vector<32x128xf32>
      %30 = arith.maximumf %29, %28 : vector<32x128xf32>
      %31 = vector.broadcast %cst_12 : f32 to vector<32x128xf32>
      %32 = arith.minimumf %31, %30 : vector<32x128xf32>
      %cst_13 = arith.constant 1.000000e+00 : f32
      %33 = vector.broadcast %cst_13 : f32 to vector<32x128xf32>
      %34 = arith.subf %33, %32 : vector<32x128xf32>
      %cst_14 = arith.constant 0.000000e+00 : f32
      %35 = vector.broadcast %cst_14 : f32 to vector<32x128xf32>
      %36 = arith.subf %35, %21 : vector<32x128xf32>
      %37 = math.log %32 : vector<32x128xf32>
      %38 = arith.mulf %36, %37 : vector<32x128xf32>
      %39 = arith.mulf %38, %34 : vector<32x128xf32>
      %40 = arith.mulf %39, %34 : vector<32x128xf32>
      %c0_15 = arith.constant 0 : index
      %c0_16 = arith.constant 0 : index
      %41 = vector.load %arg4[%c0_15, %c0_16] : memref<32x128xf32, #tpu.memory_space<vmem>>, vector<32x128xf32>
      %42 = vector.shape_cast %40 : vector<32x128xf32> to vector<1x32x128xf32>
      %cst_17 = arith.constant dense<0.000000e+00> : vector<32x128xf32>
      %43 = vector.multi_reduction <add>, %42, %cst_17 [0] : vector<1x32x128xf32> to vector<32x128xf32>
      %44 = arith.addf %41, %43 : vector<32x128xf32>
      %c0_18 = arith.constant 0 : index
      %c0_19 = arith.constant 0 : index
      %45 = vector.load %arg4[%c0_18, %c0_19] : memref<32x128xf32, #tpu.memory_space<vmem>>, vector<32x128xf32>
      tpu.vector_store %arg4[%c0_18, %c0_19], %44 {strides = array<i32>} : memref<32x128xf32, #tpu.memory_space<vmem>>, vector<32x128xf32>,
      %c0_20 = arith.constant 0 : index
      %c0_21 = arith.constant 0 : index
      %46 = vector.load %arg5[%c0_20, %c0_21] : memref<32x128xf32, #tpu.memory_space<vmem>>, vector<32x128xf32>
      %47 = vector.shape_cast %21 : vector<32x128xf32> to vector<1x32x128xf32>
      %cst_22 = arith.constant dense<0.000000e+00> : vector<32x128xf32>
      %48 = vector.multi_reduction <add>, %47, %cst_22 [0] : vector<1x32x128xf32> to vector<32x128xf32>
      %49 = arith.addf %46, %48 : vector<32x128xf32>
      %c0_23 = arith.constant 0 : index
      %c0_24 = arith.constant 0 : index
      %50 = vector.load %arg5[%c0_23, %c0_24] : memref<32x128xf32, #tpu.memory_space<vmem>>, vector<32x128xf32>
      tpu.vector_store %arg5[%c0_23, %c0_24], %49 {strides = array<i32>} : memref<32x128xf32, #tpu.memory_space<vmem>>, vector<32x128xf32>,
    } else {
    }
    return
  }
  func.func @transform_0(%arg0: i32, %arg1: i32) -> (i32, i32) {
    %c1_i32 = arith.constant 1 : i32
    %0 = arith.muli %arg0, %c1_i32 : i32
    %1 = arith.addi %0, %arg1 : i32
    %c0_i32 = arith.constant 0 : i32
    %2 = arith.minsi %1, %c0_i32 : i32
    %c0_i32_0 = arith.constant 0 : i32
    %c0_i32_1 = arith.constant 0 : i32
    return %2, %c0_i32_0 : i32, i32
  }
  func.func @transform_1(%arg0: i32, %arg1: i32) -> (i32, i32) {
    %c1_i32 = arith.constant 1 : i32
    %0 = arith.muli %arg0, %c1_i32 : i32
    %1 = arith.addi %0, %arg1 : i32
    %c0_i32 = arith.constant 0 : i32
    %2 = arith.minsi %1, %c0_i32 : i32
    %c0_i32_0 = arith.constant 0 : i32
    %c0_i32_1 = arith.constant 0 : i32
    return %2, %c0_i32_0 : i32, i32
  }
  func.func @transform_2(%arg0: i32, %arg1: i32) -> (i32, i32) {
    %c0_i32 = arith.constant 0 : i32
    %c0_i32_0 = arith.constant 0 : i32
    return %arg0, %c0_i32 : i32, i32
  }
  func.func @transform_3(%arg0: i32, %arg1: i32) -> (i32, i32) {
    %c0_i32 = arith.constant 0 : i32
    %c0_i32_0 = arith.constant 0 : i32
    return %arg0, %c0_i32 : i32, i32
  }
}

</mosaic_0001>

<bundles_post_ra>
// kernel: tpu_custom_call.1
= control target key start
LH: loop header
LB: loop body
LE: loop exit
PB: predicated region body
PF: predicated region fallthrough
CT: control target
= control target key end

     0   :  { %9 = vsyncpa [#allocation3], 0  ;;  %s514_s0 = inlined_call_operand.hbm [shape: f32[16,128], index: 0, kind: input, shape index: {}]   ;;  %s515_s1 = inlined_call_operand.hbm [shape: f32[16,128], index: 1, kind: input, shape index: {}]   ;;  %s516_s2 = inlined_call_operand.hbm [shape: f32[32,128], index: 2, kind: output, shape index: {0}]   ;;  %s517_s3 = inlined_call_operand.hbm [shape: f32[32,128], index: 3, kind: output, shape index: {1}]  }
   0x1   :  { %10 = vsyncpa [#allocation6], 0 }
   0x2   :  { %11 = vsyncpa [#allocation4], 0 }
   0x3   :  { %12 = vsyncpa [#allocation9], 0 }
   0x4   :  { %23 = vsyncadd [#allocation3], 256  ;;  %s28_s14 = sshll.u32 %s514_s0, 4  ;;  %s463_s15 = smov [#allocation2]   ;;  %s29_s14 = int_to_ptr.hbm [resolvable:$true] %s28_s14 }
   0x5   :  { %s30_s16 = sshll.u32 %s463_s15, 4  ;;  %s464_s17 = smov 128   ;;  %s31_s16 = int_to_ptr.vmem [resolvable:$true] %s30_s16 }
   0x6   :  { %s465_s18 = smov 8  }
   0x7   :  { %36 = dma.hbm_to_vmem [thread:$0]  %s29_s14, 256, %s31_s16, [#allocation3], %s464_s17, %s464_s17, %s465_s18  }
   0x8   :  { %47 = vsyncadd [#allocation6], 256  ;;  %s52_s21 = sshll.u32 %s515_s1, 4  ;;  %s466_s22 = smov [#allocation5]   ;;  %s53_s21 = int_to_ptr.hbm [resolvable:$true] %s52_s21 }
   0x9   :  { %s54_s23 = sshll.u32 %s466_s22, 4  ;;  %s55_s23 = int_to_ptr.vmem [resolvable:$true] %s54_s23 }
   0xa   :  { %60 = dma.hbm_to_vmem [thread:$0]  %s53_s21, 256, %s55_s23, [#allocation6], %s464_s17, %s464_s17, %s465_s18  }
   0xb   :  { %455 = dma.done.wait [#allocation3], 512  }
   0xc   :  { %456 = vsyncadd [#allocation3], 4294966784 }
   0xd   :  { %457 = dma.done.wait [#allocation6], 512  }
   0xe   :  { %458 = vsyncadd [#allocation6], 4294966784  ;;  %v467_v0 = vmov 0.0   ;;  %v93_v2 = vld [vmem:[#allocation2] sm:$0xff]  ;;  %v94_v3 = vld [vmem:[#allocation2 + $0x8] sm:$0xff]  ;;  %s468_s0 = smov [#allocation8]  }
   0xf   :  { %347 = vtanh.f32 %v467_v0  ;;  %296 = vst [vmem:[#allocation8 + $0x10] sm:$0xff] %v467_v0  ;;  %s315_s1 = sshll.u32 %s468_s0, 4  ;;  %s317_s26 = sshll.u32 %s517_s3, 4  ;;  %v97_v4 = vld [vmem:[#allocation5] sm:$0xff]  ;;  %v214_v5 = vmul.f32 0.5, %v93_v2  ;;  %v98_v6 = vld [vmem:[#allocation5 + $0x8] sm:$0xff]  ;;  %s316_s1 = int_to_ptr.vmem [resolvable:$true] %s315_s1  ;;  %s318_s26 = int_to_ptr.hbm [resolvable:$true] %s317_s26 }
  0x10   :  { %297 = vst [vmem:[#allocation8 + $0x18] sm:$0xff] %v467_v0  ;;  %v215_v7 = vmul.f32 0.5, %v94_v3  ;;  %v242_v28 = vsub.f32 0.0, %v97_v4  ;;  %v243_v30 = vsub.f32 0.0, %v98_v6  ;;  %s469_s3 = smov [#allocation7]   ;;  %s304_s30 = sshll.u32 %s516_s2, 4  ;;  %s305_s30 = int_to_ptr.hbm [resolvable:$true] %s304_s30 }
  0x11   :  { %349 = vtanh.f32 %v214_v5  ;;  %294 = vst [vmem:[#allocation8] sm:$0xff] %v97_v4  ;;  %s302_s27 = sshll.u32 %s469_s3, 4  ;;  %s303_s27 = int_to_ptr.vmem [resolvable:$true] %s302_s27 }
  0x12   :  { %351 = vtanh.f32 %v215_v7  ;;  %295 = vst [vmem:[#allocation8 + $0x8] sm:$0xff] %v98_v6 }
  0x13   :  { %323 = dma.vmem_to_hbm [thread:$0]  %s316_s1, 512, %s318_s26, [#allocation9], %s464_s17, %s464_s17, %s465_s18  }
  0x15   :  { %v348_v1 = vpop.eup %347 }
  0x16   :  { %v224_v8 = vmul.f32 0.5, %v348_v1 }
  0x17   :  { %v350_v12 = vpop.eup %349 }
  0x18   :  { %v228_v9 = vadd.f32 0.5, %v224_v8  ;;  %v352_v13 = vpop.eup %351  ;;  %v222_v14 = vmul.f32 0.5, %v350_v12 }
  0x19   :  { %v223_v15 = vmul.f32 0.5, %v352_v13 }
  0x1a   :  { %v232_v10 = vmax.f32 %v228_v9, 1e-07  ;;  %v226_v16 = vadd.f32 0.5, %v222_v14 }
  0x1b   :  { %v227_v17 = vadd.f32 0.5, %v223_v15 }
  0x1c   :  { %v236_v11 = vmin.f32 %v232_v10, 0.9999999  ;;  %v230_v18 = vmax.f32 %v226_v16, 1e-07 }
  0x1d   :  { %v231_v20 = vmax.f32 %v227_v17, 1e-07 }
  0x1e   :  { %353 = vlog2.f32 %v236_v11  ;;  %v234_v21 = vmin.f32 %v230_v18, 0.9999999  ;;  %v240_v22 = vsub.f32 1.0, %v236_v11 }
  0x1f   :  { %v235_v24 = vmin.f32 %v231_v20, 0.9999999 }
  0x20   :  { %355 = vlog2.f32 %v234_v21  ;;  %v238_v32 = vsub.f32 1.0, %v234_v21 }
  0x21   :  { %357 = vlog2.f32 %v235_v24  ;;  %v239_v34 = vsub.f32 1.0, %v235_v24 }
  0x24   :  { %v354_v19 = vpop.eup %353 }
  0x25   :  { %v251_v23 = vmul.f32 0.6931472, %v354_v19 }
  0x26   :  { %v356_v29 = vpop.eup %355 }
  0x27   :  { %v256_v25 = vmul.f32 0.0, %v251_v23  ;;  %v358_v31 = vpop.eup %357  ;;  %v247_v33 = vmul.f32 0.6931472, %v356_v29 }
  0x28   :  { %v249_v35 = vmul.f32 0.6931472, %v358_v31 }
  0x29   :  { %v260_v26 = vmul.f32 %v256_v25, %v240_v22  ;;  %v254_v36 = vmul.f32 %v247_v33, %v242_v28 }
  0x2a   :  { %v255_v37 = vmul.f32 %v249_v35, %v243_v30 }
  0x2b   :  { %v264_v27 = vmul.f32 %v260_v26, %v240_v22  ;;  %v258_v38 = vmul.f32 %v254_v36, %v238_v32 }
  0x2c   :  { %v259_v39 = vmul.f32 %v255_v37, %v239_v34 }
  0x2d   :  { %280 = vst [vmem:[#allocation7 + $0x10] sm:$0xff] %v264_v27  ;;  %v262_v40 = vmul.f32 %v258_v38, %v238_v32 }
  0x2e   :  { %281 = vst [vmem:[#allocation7 + $0x18] sm:$0xff] %v264_v27  ;;  %v263_v41 = vmul.f32 %v259_v39, %v239_v34 }
  0x2f   :  { %278 = vst [vmem:[#allocation7] sm:$0xff] %v262_v40 }
  0x30   :  { %279 = vst [vmem:[#allocation7 + $0x8] sm:$0xff] %v263_v41 }
  0x31   :  { %310 = dma.vmem_to_hbm [thread:$0]  %s303_s27, 512, %s305_s30, [#allocation4], %s464_s17, %s464_s17, %s465_s18  }
  0x32   :  { %459 = dma.done.wait [#allocation4], 512  }
  0x33   :  { %460 = vsyncadd [#allocation4], 4294966784 }
  0x34   :  { %461 = dma.done.wait [#allocation9], 512  }
  0x35   :  { %462 = vsyncadd [#allocation9], 4294966784 }
  0x36   :  { %332 = vsyncpa [#allocation3], 1 }
  0x37   :  { %333 = vsyncpa [#allocation6], 1 }
  0x38   :  { %334 = vsyncpa [#allocation4], 1 }
  0x39   :  { %335 = vsyncpa [#allocation9], 1 }

</bundles_post_ra>
